<compile_context>
chip_gen: v7x
topology: tpu7x:2x2x1
jax: 0.10.0
libtpu: 0.0.40
codegen_flags: <defaults>
</compile_context>

<pallas_src>
import jax
import jax.numpy as jnp
from jax.experimental import pallas as pl
from jax.experimental.pallas import tpu as pltpu

_LANES = 128


def _mlp_kernel(x_ref, w1_ref, b1_ref, w2_ref, b2_ref, w3_ref, b3_ref, o_ref):
    mm_dtype = w1_ref.dtype
    # fc1 + relu  (in-kernel bf16 cast of x; f32 accumulation / elementwise)
    x = x_ref[...].astype(mm_dtype)
    h1 = jnp.dot(x, w1_ref[...], preferred_element_type=jnp.float32)
    h1 = jnp.maximum(h1 + b1_ref[...], 0.0)
    # fc2 + relu
    h2 = jnp.dot(h1.astype(mm_dtype), w2_ref[...],
                 preferred_element_type=jnp.float32)
    h2 = jnp.maximum(h2 + b2_ref[...], 0.0)
    # fc3 + sigmoid with the batch on the lane axis:
    #   z[o, m] = sum_h w3[o, h] * h2[m, h]   -> (Dout, tile_m) lane-dense block
    z = jax.lax.dot_general(
        w3_ref[...], h2.astype(mm_dtype),
        dimension_numbers=(((1,), (1,)), ((), ())),
        preferred_element_type=jnp.float32,
    )
    z = z + b3_ref[...]                         # (Dout, 1) broadcast over lanes
    o_ref[...] = jax.nn.sigmoid(z).astype(o_ref.dtype)


def _round_up(n, m):
    return pl.cdiv(n, m) * m


def _choose_tile_m(batch, requested):
    """Lane-aligned batch tile: clamp for small batches, split for v7x 2 TCs."""
    requested = max(_LANES, _round_up(requested, _LANES))
    b_pad = _round_up(batch, _LANES)
    tm = min(requested, b_pad)
    # If the padded batch would fit in one (or 1.x) tile but could fill two,
    # halve the tile so the "parallel" grid axis has >=2 steps (v7x megacore).
    if b_pad >= 2 * _LANES and b_pad < 2 * tm:
        tm = _round_up(pl.cdiv(b_pad, 2), _LANES)
    return tm


def mlp_forward(x, params, *, tile_m=1024, matmul_dtype=jnp.bfloat16):
    """Fused MLP forward. x: (B, input_dim) float32.
    Returns the squeezed output, matching torch's `x.squeeze()` semantics."""
    w1, b1, w2, b2, w3, b3 = params      # weights stored (in_features, out_features)
    B, Din = x.shape
    H1 = w1.shape[1]                     # 128
    H2 = w2.shape[1]                     # 64
    Dout = w3.shape[1]

    tm = _choose_tile_m(B, tile_m)
    Bp = _round_up(B, tm)
    if Bp != B:
        x = jnp.pad(x, ((0, Bp - B), (0, 0)))    # tail-only zero pad

    # tiny, one-time reshuffles / casts of the constant params
    w1c = w1.astype(matmul_dtype)
    w2c = w2.astype(matmul_dtype)
    w3c = w3.T.astype(matmul_dtype)              # (Dout, H2), PyTorch-native layout
    b3c = b3.reshape(Dout, 1)                    # broadcast over the lane (batch) axis

    grid = (Bp // tm,)

    out = pl.pallas_call(
        _mlp_kernel,
        out_shape=jax.ShapeDtypeStruct((Dout, Bp), jnp.float32),
        grid_spec=pltpu.PrefetchScalarGridSpec(
            num_scalar_prefetch=0,
            grid=grid,
            in_specs=[
                # x: the only streamed operand, tiled over the batch axis
                # (f32 in HBM, cast to bf16 in-kernel).
                pl.BlockSpec((tm, Din), lambda i: (i, 0)),
                # weights / biases: tiny, full-array, resident across the grid.
                pl.BlockSpec((Din, H1), lambda i: (0, 0)),
                pl.BlockSpec((1, H1), lambda i: (0, 0)),
                pl.BlockSpec((H1, H2), lambda i: (0, 0)),
                pl.BlockSpec((1, H2), lambda i: (0, 0)),
                pl.BlockSpec((Dout, H2), lambda i: (0, 0)),
                pl.BlockSpec((Dout, 1), lambda i: (0, 0)),
            ],
            # lane-dense (Dout, tile_m) output block: batch sits on the lane axis.
            out_specs=pl.BlockSpec((Dout, tm), lambda i: (0, i)),
        ),
        compiler_params=pltpu.CompilerParams(
            dimension_semantics=("parallel",),
        ),
    )(x, w1c, b1, w2c, b2, w3c, b3c)

    if Dout == 1:
        result = out[0, :B]                      # (B,)
    else:
        result = out[:, :B].T                    # (B, Dout)
    # torch: x.squeeze() drops all size-1 dims
    return jnp.squeeze(result)


def init_params(key, input_dim, output_dim):
    """Deterministic parameter init (shapes match the nn.Linear layers of MLP)."""
    ks = jax.random.split(key, 6)

    def lin(kw, kb, fan_in, fan_out):
        bound = 1.0 / jnp.sqrt(fan_in)
        w = jax.random.uniform(kw, (fan_in, fan_out), jnp.float32, -bound, bound)
        b = jax.random.uniform(kb, (1, fan_out), jnp.float32, -bound, bound)
        return w, b

    w1, b1 = lin(ks[0], ks[1], input_dim, 128)
    w2, b2 = lin(ks[2], ks[3], 128, 64)
    w3, b3 = lin(ks[4], ks[5], 64, output_dim)
    return (w1, b1, w2, b2, w3, b3)


def mlp_reference(x, params):
    w1, b1, w2, b2, w3, b3 = params
    h1 = jnp.maximum(x @ w1 + b1, 0.0)
    h2 = jnp.maximum(h1 @ w2 + b2, 0.0)
    return jnp.squeeze(jax.nn.sigmoid(h2 @ w3 + b3))


if __name__ == "__main__":
    key = jax.random.PRNGKey(0)
    k_x, k_p = jax.random.split(key)

    batch = 16
    input_dim = 32
    output_dim = 1  # NumerAI-style single-target head

    x = jax.random.normal(k_x, (batch, input_dim), jnp.float32)
    params = init_params(k_p, input_dim, output_dim)

    out = mlp_forward(x, params)          # bf16 MXU operands, f32 accumulation
    out = jax.block_until_ready(out)

    ref = mlp_reference(x, params)        # pure-f32 reference
    assert out.shape == ref.shape, (out.shape, ref.shape)
    # bf16 matmul operands / bf16-rounded activations -> loosened tolerance.
    assert jnp.allclose(out, ref, atol=2e-2, rtol=2e-2), "mismatch vs reference"

    print("KERNEL_OK")
</pallas_src>

<mosaic_0001>
module attributes {stable_mosaic.version = 11 : i64} {
  func.func @_mlp_kernel(%arg0: i32, %arg1: memref<128x32xf32, #tpu.memory_space<vmem>>, %arg2: memref<32x128xbf16, #tpu.memory_space<vmem>>, %arg3: memref<1x128xf32, #tpu.memory_space<vmem>>, %arg4: memref<128x64xbf16, #tpu.memory_space<vmem>>, %arg5: memref<1x64xf32, #tpu.memory_space<vmem>>, %arg6: memref<1x64xbf16, #tpu.memory_space<vmem>>, %arg7: memref<1x1xf32, #tpu.memory_space<vmem>>, %arg8: memref<1x128xf32, #tpu.memory_space<vmem>>) attributes {dimension_semantics = [#tpu.dimension_semantics<parallel>], iteration_bounds = array<i64: 1>, scalar_prefetch = 0 : i64, scratch_operands = 0 : i64, tpu.core_type = #tpu.core_type<tc>, window_params = [{transform_indices = @transform_0, window_bounds = array<i64: 128, 32>}, {pipeline_mode = #tpu.pipeline_mode<synchronous>, transform_indices = @transform_1, window_bounds = array<i64: 32, 128>}, {pipeline_mode = #tpu.pipeline_mode<synchronous>, transform_indices = @transform_2, window_bounds = array<i64: 1, 128>}, {pipeline_mode = #tpu.pipeline_mode<synchronous>, transform_indices = @transform_3, window_bounds = array<i64: 128, 64>}, {pipeline_mode = #tpu.pipeline_mode<synchronous>, transform_indices = @transform_4, window_bounds = array<i64: 1, 64>}, {pipeline_mode = #tpu.pipeline_mode<synchronous>, transform_indices = @transform_5, window_bounds = array<i64: 1, 64>}, {pipeline_mode = #tpu.pipeline_mode<synchronous>, transform_indices = @transform_6, window_bounds = array<i64: 1, 1>}, {transform_indices = @transform_7, window_bounds = array<i64: 1, 128>}]} {
    %c0 = arith.constant 0 : index
    %c0_0 = arith.constant 0 : index
    %0 = vector.load %arg1[%c0, %c0_0] : memref<128x32xf32, #tpu.memory_space<vmem>>, vector<128x32xf32>
    %1 = arith.truncf %0 : vector<128x32xf32> to vector<128x32xbf16>
    %c0_1 = arith.constant 0 : index
    %c0_2 = arith.constant 0 : index
    %2 = vector.load %arg2[%c0_1, %c0_2] : memref<32x128xbf16, #tpu.memory_space<vmem>>, vector<32x128xbf16>
    %cst = arith.constant dense<0.000000e+00> : vector<128x128xf32>
    %3 = tpu.matmul %1, %2, %cst {dimension_numbers = #tpu.dot_dimension_numbers<[1], [0], [0], [1], [0, 0, 1, 1], [], []>} : vector<128x32xbf16>, vector<32x128xbf16>, vector<128x128xf32> -> vector<128x128xf32>
    %c0_3 = arith.constant 0 : index
    %c0_4 = arith.constant 0 : index
    %4 = vector.load %arg3[%c0_3, %c0_4] : memref<1x128xf32, #tpu.memory_space<vmem>>, vector<1x128xf32>
    %5 = vector.broadcast %4 : vector<1x128xf32> to vector<128x128xf32>
    %6 = arith.addf %3, %5 : vector<128x128xf32>
    %cst_5 = arith.constant 0.000000e+00 : f32
    %7 = vector.broadcast %cst_5 : f32 to vector<128x128xf32>
    %8 = arith.maximumf %6, %7 : vector<128x128xf32>
    %9 = arith.truncf %8 : vector<128x128xf32> to vector<128x128xbf16>
    %c0_6 = arith.constant 0 : index
    %c0_7 = arith.constant 0 : index
    %10 = vector.load %arg4[%c0_6, %c0_7] : memref<128x64xbf16, #tpu.memory_space<vmem>>, vector<128x64xbf16>
    %cst_8 = arith.constant dense<0.000000e+00> : vector<128x64xf32>
    %11 = tpu.matmul %9, %10, %cst_8 {dimension_numbers = #tpu.dot_dimension_numbers<[1], [0], [0], [1], [0, 0, 1, 1], [], []>} : vector<128x128xbf16>, vector<128x64xbf16>, vector<128x64xf32> -> vector<128x64xf32>
    %c0_9 = arith.constant 0 : index
    %c0_10 = arith.constant 0 : index
    %12 = vector.load %arg5[%c0_9, %c0_10] : memref<1x64xf32, #tpu.memory_space<vmem>>, vector<1x64xf32>
    %13 = vector.broadcast %12 : vector<1x64xf32> to vector<128x64xf32>
    %14 = arith.addf %11, %13 : vector<128x64xf32>
    %cst_11 = arith.constant 0.000000e+00 : f32
    %15 = vector.broadcast %cst_11 : f32 to vector<128x64xf32>
    %16 = arith.maximumf %14, %15 : vector<128x64xf32>
    %c0_12 = arith.constant 0 : index
    %c0_13 = arith.constant 0 : index
    %17 = vector.load %arg6[%c0_12, %c0_13] : memref<1x64xbf16, #tpu.memory_space<vmem>>, vector<1x64xbf16>
    %18 = arith.truncf %16 : vector<128x64xf32> to vector<128x64xbf16>
    %cst_14 = arith.constant dense<0.000000e+00> : vector<1x128xf32>
    %19 = tpu.matmul %17, %18, %cst_14 {dimension_numbers = #tpu.dot_dimension_numbers<[1], [1], [0], [0], [0, 0, 1, 0], [], []>} : vector<1x64xbf16>, vector<128x64xbf16>, vector<1x128xf32> -> vector<1x128xf32>
    %c0_15 = arith.constant 0 : index
    %c0_16 = arith.constant 0 : index
    %20 = vector.load %arg7[%c0_15, %c0_16] : memref<1x1xf32, #tpu.memory_space<vmem>>, vector<1x1xf32>
    %21 = vector.broadcast %20 : vector<1x1xf32> to vector<1x128xf32>
    %22 = arith.addf %19, %21 : vector<1x128xf32>
    %23 = arith.negf %22 : vector<1x128xf32>
    %24 = math.exp %23 : vector<1x128xf32>
    %cst_17 = arith.constant 1.000000e+00 : f32
    %25 = vector.broadcast %cst_17 : f32 to vector<1x128xf32>
    %26 = arith.addf %25, %24 : vector<1x128xf32>
    %27 = arith.divf %25, %26 : vector<1x128xf32>
    %c0_18 = arith.constant 0 : index
    %c0_19 = arith.constant 0 : index
    %28 = vector.load %arg8[%c0_18, %c0_19] : memref<1x128xf32, #tpu.memory_space<vmem>>, vector<1x128xf32>
    tpu.vector_store %arg8[%c0_18, %c0_19], %27 {strides = array<i32>} : memref<1x128xf32, #tpu.memory_space<vmem>>, vector<1x128xf32>,
    return
  }
  func.func @transform_0(%arg0: i32) -> (i32, i32) {
    %c0_i32 = arith.constant 0 : i32
    %c0_i32_0 = arith.constant 0 : i32
    return %arg0, %c0_i32 : i32, i32
  }
  func.func @transform_1(%arg0: i32) -> (i32, i32) {
    %c0_i32 = arith.constant 0 : i32
    %c0_i32_0 = arith.constant 0 : i32
    %c0_i32_1 = arith.constant 0 : i32
    return %c0_i32, %c0_i32_0 : i32, i32
  }
  func.func @transform_2(%arg0: i32) -> (i32, i32) {
    %c0_i32 = arith.constant 0 : i32
    %c0_i32_0 = arith.constant 0 : i32
    %c0_i32_1 = arith.constant 0 : i32
    return %c0_i32, %c0_i32_0 : i32, i32
  }
  func.func @transform_3(%arg0: i32) -> (i32, i32) {
    %c0_i32 = arith.constant 0 : i32
    %c0_i32_0 = arith.constant 0 : i32
    %c0_i32_1 = arith.constant 0 : i32
    return %c0_i32, %c0_i32_0 : i32, i32
  }
  func.func @transform_4(%arg0: i32) -> (i32, i32) {
    %c0_i32 = arith.constant 0 : i32
    %c0_i32_0 = arith.constant 0 : i32
    %c0_i32_1 = arith.constant 0 : i32
    return %c0_i32, %c0_i32_0 : i32, i32
  }
  func.func @transform_5(%arg0: i32) -> (i32, i32) {
    %c0_i32 = arith.constant 0 : i32
    %c0_i32_0 = arith.constant 0 : i32
    %c0_i32_1 = arith.constant 0 : i32
    return %c0_i32, %c0_i32_0 : i32, i32
  }
  func.func @transform_6(%arg0: i32) -> (i32, i32) {
    %c0_i32 = arith.constant 0 : i32
    %c0_i32_0 = arith.constant 0 : i32
    %c0_i32_1 = arith.constant 0 : i32
    return %c0_i32, %c0_i32_0 : i32, i32
  }
  func.func @transform_7(%arg0: i32) -> (i32, i32) {
    %c0_i32 = arith.constant 0 : i32
    %c0_i32_0 = arith.constant 0 : i32
    return %c0_i32, %arg0 : i32, i32
  }
}

</mosaic_0001>

<bundles_post_ra>
// kernel: tpu_custom_call.1
= control target key start
LH: loop header
LB: loop body
LE: loop exit
PB: predicated region body
PF: predicated region fallthrough
CT: control target
= control target key end

     0   :  { %s859_s0 = inlined_call_operand.vmem [shape: f32[128,32], index: 0, kind: input, shape index: {}]   ;;  %s860_s1 = inlined_call_operand.vmem [shape: bf16[32,128], index: 1, kind: input, shape index: {}]   ;;  %s861_s2 = inlined_call_operand.vmem [shape: f32[1,128], index: 2, kind: input, shape index: {}]   ;;  %s862_s3 = inlined_call_operand.vmem [shape: bf16[128,64], index: 3, kind: input, shape index: {}]   ;;  %s863_s4 = inlined_call_operand.vmem [shape: f32[1,64], index: 4, kind: input, shape index: {}]   ;;  %s864_s5 = inlined_call_operand.vmem [shape: bf16[1,64], index: 5, kind: input, shape index: {}]   ;;  %s865_s6 = inlined_call_operand.<no memory space> [shape: f32[1,1], index: 6, kind: input, shape index: {}]   ;;  %s866_s7 = inlined_call_operand.hbm [shape: f32[1,128], index: 7, kind: output, shape index: {}]  }
   0x1   :  { %v12_v0 = vstv %s865_s6 }
   0x2   :  { %13 = vst [vmem:[#allocation2] sm:$0x1] %v12_v0 }
   0x3   :  { %v649_v1 = vld [vmem:[%s860_s1] sm:$0xff]   ;;  %v650_v2 = vld [vmem:[%s860_s1 + $0x8] sm:$0xff]   ;;  %vm77_vm0 = vcmask 261120   ;;  %v32_v6 = vld [vmem:[%s859_s0 + $0x10] sm:$0xff] }
   0x4   :  { %572 = vmatprep.subr.bf16.mxu1 %v649_v1  ;;  %v30_v3 = vld [vmem:[%s859_s0] sm:$0xff]  ;;  %v31_v4 = vld [vmem:[%s859_s0 + $0x8] sm:$0xff]  ;;  %v33_v7 = vld [vmem:[%s859_s0 + $0x18] sm:$0xff] }
   0x5   :  { %573 = vmatpush3.bf16.msra.mxu1 %v649_v1  ;;  %v46_v5 = vpack.c.bf16 %v31_v4, %v30_v3  ;;  %v34_v8 = vld [vmem:[%s859_s0 + $0x20] sm:$0xff]  ;;  %v35_v9 = vld [vmem:[%s859_s0 + $0x28] sm:$0xff]  ;;  %v47_v10 = vpack.c.bf16 %v33_v7, %v32_v6  ;;  %v36_v13 = vld [vmem:[%s859_s0 + $0x30] sm:$0xff] }
   0x6   :  { %574 = vmatprep.subr.bf16.mxu1 %v650_v2  ;;  %v48_v11 = vpack.c.bf16 %v35_v9, %v34_v8  ;;  %v651_v12 = vld [vmem:[%s862_s3] sm:$0xff]   ;;  %v37_v14 = vld [vmem:[%s859_s0 + $0x38] sm:$0xff]  ;;  %v652_v15 = vld [vmem:[%s862_s3 + $0x8] sm:$0xff]  }
   0x7   :  { %576 = vmatprep.mubr.msk.bf16.mxu1 %vm77_vm0, %v46_v5  ;;  %v38_v16 = vld [vmem:[%s859_s0 + $0x40] sm:$0xff]  ;;  %v39_v17 = vld [vmem:[%s859_s0 + $0x48] sm:$0xff]  ;;  %v653_v18 = vld [vmem:[%s862_s3 + $0x10] sm:$0xff]   ;;  %v49_v19 = vpack.c.bf16 %v37_v14, %v36_v13 }
   0x9   :  { %575 = vmatpush3.bf16.msra.mxu1 %v650_v2 }
   0xa   :  { %592 = vmatprep.subr.bf16.mxu1 %v651_v12 }
   0xc   :  { %577 = vmatmul.mubr.msk.bf16.vlgmr.msra.gmra.mrb[0].mxu1 %vm77_vm0, %v47_v10 }
   0xd   :  { %580 = vmatprep.mubr.msk.bf16.mxu1 %vm77_vm0, %v48_v11  ;;  %593 = vmatpush3.bf16.msra.mxu1 %v651_v12 }
   0xe   :  { %594 = vmatprep.subr.bf16.mxu1 %v652_v15 }
   0xf   :  { %14 = vsyncpa [#allocation4], 0  ;;  %v50_v20 = vpack.c.bf16 %v39_v17, %v38_v16  ;;  %v654_v21 = vld [vmem:[%s862_s3 + $0x18] sm:$0xff]   ;;  %v40_v22 = vld [vmem:[%s859_s0 + $0x50] sm:$0xff]  ;;  %vm688_vm1 = vmmov 0   ;;  %vm426_vm2 = vcmask 523264  }
  0x10   :  { %v41_v23 = vld [vmem:[%s859_s0 + $0x58] sm:$0xff]  ;;  %v42_v24 = vld [vmem:[%s859_s0 + $0x60] sm:$0xff]  ;;  %v43_v25 = vld [vmem:[%s859_s0 + $0x68] sm:$0xff]  ;;  %s690_s30 = smov [#allocation3]  }
  0x11   :  { %595 = vmatpush3.bf16.msra.mxu1 %v652_v15  ;;  %v655_v26 = vld [vmem:[%s862_s3 + $0x20] sm:$0xff]   ;;  %v51_v27 = vpack.c.bf16 %v41_v23, %v40_v22  ;;  %v52_v28 = vpack.c.bf16 %v43_v25, %v42_v24  ;;  %v656_v29 = vld [vmem:[%s862_s3 + $0x28] sm:$0xff]   ;;  %v44_v30 = vld [vmem:[%s859_s0 + $0x70] sm:$0xff]  ;;  %s507_s8 = sshll.u32 %s690_s30, 4  ;;  %s508_s8 = int_to_ptr.vmem [resolvable:$true] %s507_s8 }
  0x12   :  { %596 = vmatprep.subr.bf16.mxu1 %v653_v18  ;;  %v45_v31 = vld [vmem:[%s859_s0 + $0x78] sm:$0xff]  ;;  %v657_v33 = vld [vmem:[%s862_s3 + $0x30] sm:$0xff]   ;;  %v515_v35 = vld [vmem:[%s861_s2] ss:$0 sm:$0xff]  ;;  %s667_s9 = scalar_lea.vmem %s508_s8, 32  ;;  %p668_p1 = scmp.lt.s32.totalorder %s508_s8, %s508_s8 }
  0x13   :  { %v53_v32 = vpack.c.bf16 %v45_v31, %v44_v30  ;;  %v658_v34 = vld [vmem:[%s862_s3 + $0x38] sm:$0xff]   ;;  %v689_v30 = vmov 0   ;;  %v526_v31 = vld [vmem:[%s863_s4] ss:$0 sm:$0xff] }
  0x14   :  { %581 = vmatmul.mubr.msk.bf16.gmra.mrb[4].mxu1 %vm77_vm0, %v49_v19  ;;  %648 = vset.pattern.permute.xlu0 %v689_v30 }
  0x15   :  { %584 = vmatprep.mubr.msk.bf16.mxu1 %vm77_vm0, %v50_v20  ;;  %597 = vmatpush3.bf16.msra.mxu1 %v653_v18 }
  0x16   :  { %598 = vmatprep.subr.bf16.mxu1 %v654_v21 }
  0x19   :  { %599 = vmatpush3.bf16.msra.mxu1 %v654_v21 }
  0x1a   :  { %600 = vmatprep.subr.bf16.mxu1 %v655_v26 }
  0x1c   :  { %585 = vmatmul.mubr.msk.bf16.gmra.mrb[8].mxu1 %vm77_vm0, %v51_v27 }
  0x1d   :  { %588 = vmatprep.mubr.msk.bf16.mxu1 %vm77_vm0, %v52_v28  ;;  %601 = vmatpush3.bf16.msra.mxu1 %v655_v26  ;;  %v687_v28 = vmov 0.0  }
  0x1e   :  { %602 = vmatprep.subr.bf16.mxu1 %v656_v29  ;;  %624 = vmatprep.subr.bf16.mxu0 %v687_v28 }
  0x1f   :  { %640 = vmatprep.mubr.msk.bf16.mxu0 %vm688_vm1, %v687_v28 }
  0x21   :  { %603 = vmatpush3.bf16.msra.mxu1 %v656_v29  ;;  %v416_v29 = vld [vmem:[#allocation2] sm:$0x1] }
  0x22   :  { %604 = vmatprep.subr.bf16.mxu1 %v657_v33  ;;  %419 = vperm.xlu0 %648, %v416_v29  }
  0x24   :  { %589 = vmatmul.mubr.msk.bf16.gmra.mrb[12].mxu1 %vm77_vm0, %v53_v32 }
  0x25   :  { %605 = vmatpush3.bf16.msra.mxu1 %v657_v33 }
  0x26   :  { %606 = vmatprep.subr.bf16.mxu1 %v658_v34 }
  0x29   :  { %607 = vmatpush3.bf16.msra.mxu1 %v658_v34 }
  0xdf   :  { %v578_v36 = vpop.f32.mrb[0].mxu1 }
  0xe0   :  { %v145_v37 = vadd.f32 %v578_v36, %v515_v35  ;;  %v136_v38 = vpop.f32.mrb[1].mxu1 }
  0xe1   :  { %v137_v39 = vadd.f32 %v515_v35, %v136_v38  ;;  %v579_v40 = vpop.f32.mrb[2].mxu1 }
  0xe2   :  { %v148_v41 = vadd.f32 %v579_v40, %v515_v35  ;;  %v139_v42 = vpop.f32.mrb[3].mxu1  ;;  %v201_v44 = vmax.f32 %v145_v37, 0.0 }
  0xe3   :  { %v140_v43 = vadd.f32 %v515_v35, %v139_v42  ;;  %v199_v46 = vmax.f32 %v137_v39, 0.0 }
  0xe4   :  { %v202_v45 = vmax.f32 %v148_v41, 0.0 }
  0xe5   :  { %v200_v47 = vmax.f32 %v140_v43, 0.0 }
  0xe6   :  { %v216_v48 = vpack.c.bf16 %v202_v45, %v201_v44 }
  0xe7   :  { %v215_v49 = vpack.c.bf16 %v200_v47, %v199_v46  ;;  %v582_v50 = vpop.f32.mrb[4].mxu1 }
  0xe8   :  { %v161_v51 = vadd.f32 %v582_v50, %v515_v35  ;;  %v152_v52 = vpop.f32.mrb[5].mxu1 }
  0xe9   :  { %v153_v53 = vadd.f32 %v515_v35, %v152_v52  ;;  %608 = vmatprep.mubr.bf16.mxu1 %v215_v49  ;;  %v583_v54 = vpop.f32.mrb[6].mxu1 }
  0xea   :  { %v205_v55 = vmax.f32 %v161_v51, 0.0  ;;  %v164_v56 = vadd.f32 %v583_v54, %v515_v35  ;;  %609 = vmatmul.mubr.bf16.vlgmr.msra.gmra.mrb[16].mxu1 %v216_v48  ;;  %v155_v57 = vpop.f32.mrb[7].mxu1 }
  0xeb   :  { %v203_v58 = vmax.f32 %v153_v53, 0.0  ;;  %v156_v59 = vadd.f32 %v515_v35, %v155_v57 }
  0xec   :  { %v206_v60 = vmax.f32 %v164_v56, 0.0 }
  0xed   :  { %v204_v61 = vmax.f32 %v156_v59, 0.0 }
  0xee   :  { %v218_v62 = vpack.c.bf16 %v206_v60, %v205_v55 }
  0xef   :  { %v217_v63 = vpack.c.bf16 %v204_v61, %v203_v58  ;;  %v586_v0 = vpop.f32.mrb[8].mxu1 }
  0xf0   :  { %v177_v1 = vadd.f32 %v586_v0, %v515_v35  ;;  %v168_v2 = vpop.f32.mrb[9].mxu1 }
  0xf1   :  { %612 = vmatprep.mubr.bf16.mxu1 %v217_v63  ;;  %v169_v3 = vadd.f32 %v515_v35, %v168_v2  ;;  %v587_v4 = vpop.f32.mrb[10].mxu1 }
  0xf2   :  { %613 = vmatmul.mubr.bf16.gmra.mrb[20].mxu1 %v218_v62  ;;  %v209_v5 = vmax.f32 %v177_v1, 0.0  ;;  %v180_v6 = vadd.f32 %v587_v4, %v515_v35  ;;  %v171_v7 = vpop.f32.mrb[11].mxu1 }
  0xf3   :  { %v207_v8 = vmax.f32 %v169_v3, 0.0  ;;  %v172_v9 = vadd.f32 %v515_v35, %v171_v7 }
  0xf4   :  { %v210_v10 = vmax.f32 %v180_v6, 0.0 }
  0xf5   :  { %v208_v11 = vmax.f32 %v172_v9, 0.0 }
  0xf6   :  { %v220_v12 = vpack.c.bf16 %v210_v10, %v209_v5 }
  0xf7   :  { %v219_v13 = vpack.c.bf16 %v208_v11, %v207_v8  ;;  %v590_v14 = vpop.f32.mrb[12].mxu1 }
  0xf8   :  { %v193_v15 = vadd.f32 %v590_v14, %v515_v35  ;;  %v184_v16 = vpop.f32.mrb[13].mxu1 }
  0xf9   :  { %616 = vmatprep.mubr.bf16.mxu1 %v219_v13  ;;  %v185_v17 = vadd.f32 %v515_v35, %v184_v16  ;;  %v591_v18 = vpop.f32.mrb[14].mxu1 }
  0xfa   :  { %617 = vmatmul.mubr.bf16.gmra.mrb[24].mxu1 %v220_v12  ;;  %v213_v19 = vmax.f32 %v193_v15, 0.0  ;;  %v196_v20 = vadd.f32 %v591_v18, %v515_v35  ;;  %v187_v21 = vpop.f32.mrb[15].mxu1 }
  0xfb   :  { %v211_v22 = vmax.f32 %v185_v17, 0.0  ;;  %v188_v23 = vadd.f32 %v515_v35, %v187_v21 }
  0xfc   :  { %v214_v24 = vmax.f32 %v196_v20, 0.0 }
  0xfd   :  { %v212_v25 = vmax.f32 %v188_v23, 0.0 }
  0xfe   :  { %v222_v26 = vpack.c.bf16 %v214_v24, %v213_v19 }
  0xff   :  { %v221_v27 = vpack.c.bf16 %v212_v25, %v211_v22 }
 0x101   :  { %620 = vmatprep.mubr.bf16.mxu1 %v221_v27 }
 0x102   :  { %621 = vmatmul.mubr.bf16.gmra.mrb[28].mxu1 %v222_v26 }
 0x1bd   :  { %v610_v32 = vpop.f32.mrb[16].mxu1 }
 0x1be   :  { %v337_v33 = vadd.f32 %v610_v32, %v526_v31  ;;  %v328_v34 = vpop.f32.mrb[17].mxu1 }
 0x1bf   :  { %v329_v35 = vadd.f32 %v526_v31, %v328_v34  ;;  %v611_v36 = vpop.f32.mrb[18].mxu1  ;;  %v422_v34 = vlaneseq }
 0x1c0   :  { %v340_v37 = vadd.f32 %v611_v36, %v526_v31  ;;  %v331_v38 = vpop.f32.mrb[19].mxu1  ;;  %v393_v40 = vmax.f32 %v337_v33, 0.0  ;;  %v407_v33 = vld [vmem:[%s864_s5] sm:$0x1]  ;;  %s663_s5 = scalar_lea.vmem %s508_s8, 16 }
 0x1c1   :  { %v332_v39 = vadd.f32 %v526_v31, %v331_v38  ;;  %v391_v42 = vmax.f32 %v329_v35, 0.0  ;;  %v423_v35 = vshrl.u32 %v422_v34, 7  ;;  %p664_p0 = scmp.ne.s32.totalorder %s508_s8, %s663_s5  ;;  %p669_p2 = scmp.lt.s32.totalorder %s667_s9, %s663_s5 }
 0x1c2   :  { %v394_v41 = vmax.f32 %v340_v37, 0.0  ;;  %v420_v37 = vpop.permute.xlu0 %419 }
 0x1c3   :  { %v392_v43 = vmax.f32 %v332_v39, 0.0  ;;  %v424_v36 = vsub.s32 0, %v423_v35  ;;  %p670_p3 = por %p669_p2, %p668_p1 }
 0x1c4   :  { %v409_v44 = vpack.c.bf16 %v394_v41, %v393_v40 }
 0x1c5   :  { %v614_v45 = vpop.f32.mrb[20].mxu1  ;;  %v408_v46 = vpack.c.bf16 %v392_v43, %v391_v42  ;;  %v425_v38 = vrot.slane %v420_v37, %v424_v36  ;;  %p671_p4 = pnand %p670_p3, %p664_p0 }
 0x1c6   :  { %v353_v47 = vadd.f32 %v614_v45, %v526_v31  ;;  %v344_v48 = vpop.f32.mrb[21].mxu1  ;;  %v434_v0 = vsel %vm426_vm2, %v409_v44, 0 }
 0x1c7   :  { %v345_v49 = vadd.f32 %v526_v31, %v344_v48  ;;  %v615_v50 = vpop.f32.mrb[22].mxu1  ;;  %v431_v51 = vsel %vm426_vm2, %v408_v46, 0 }
 0x1c8   :  { %v397_v52 = vmax.f32 %v353_v47, 0.0  ;;  %v356_v53 = vadd.f32 %v615_v50, %v526_v31  ;;  %625 = vmatpush3.bf16.xpose.msra.mxu0 %v431_v51  ;;  %v347_v54 = vpop.f32.mrb[23].mxu1 }
 0x1c9   :  { %v395_v55 = vmax.f32 %v345_v49, 0.0  ;;  %v348_v56 = vadd.f32 %v526_v31, %v347_v54  ;;  %626 = vmatprep.subr.bf16.mxu0 %v687_v28 }
 0x1ca   :  { %v398_v57 = vmax.f32 %v356_v53, 0.0 }
 0x1cb   :  { %v396_v58 = vmax.f32 %v348_v56, 0.0 }
 0x1cc   :  { %v411_v59 = vpack.c.bf16 %v398_v57, %v397_v52 }
 0x1cd   :  { %v410_v60 = vpack.c.bf16 %v396_v58, %v395_v55  ;;  %v618_v61 = vpop.f32.mrb[24].mxu1 }
 0x1ce   :  { %v369_v62 = vadd.f32 %v618_v61, %v526_v31  ;;  %v360_v63 = vpop.f32.mrb[25].mxu1  ;;  %v440_v27 = vsel %vm426_vm2, %v411_v59, 0 }
 0x1cf   :  { %v361_v1 = vadd.f32 %v526_v31, %v360_v63  ;;  %v619_v2 = vpop.f32.mrb[26].mxu1  ;;  %v437_v15 = vsel %vm426_vm2, %v410_v60, 0 }
 0x1d0   :  { %627 = vmatpush3.bf16.xpose.msra.mxu0 %v434_v0  ;;  %v401_v3 = vmax.f32 %v369_v62, 0.0  ;;  %v372_v4 = vadd.f32 %v619_v2, %v526_v31  ;;  %v363_v5 = vpop.f32.mrb[27].mxu1 }
 0x1d1   :  { %v399_v6 = vmax.f32 %v361_v1, 0.0  ;;  %628 = vmatprep.subr.bf16.mxu0 %v687_v28  ;;  %v364_v7 = vadd.f32 %v526_v31, %v363_v5 }
 0x1d2   :  { %v402_v8 = vmax.f32 %v372_v4, 0.0 }
 0x1d3   :  { %v400_v9 = vmax.f32 %v364_v7, 0.0 }
 0x1d4   :  { %v413_v10 = vpack.c.bf16 %v402_v8, %v401_v3 }
 0x1d5   :  { %v412_v11 = vpack.c.bf16 %v400_v9, %v399_v6  ;;  %v622_v12 = vpop.f32.mrb[28].mxu1 }
 0x1d6   :  { %v385_v13 = vadd.f32 %v622_v12, %v526_v31  ;;  %v376_v14 = vpop.f32.mrb[29].mxu1  ;;  %v446_v30 = vsel %vm426_vm2, %v413_v10, 0 }
 0x1d7   :  { %v377_v16 = vadd.f32 %v526_v31, %v376_v14  ;;  %v623_v17 = vpop.f32.mrb[30].mxu1  ;;  %v443_v29 = vsel %vm426_vm2, %v412_v11, 0 }
 0x1d8   :  { %629 = vmatpush3.bf16.xpose.msra.mxu0 %v437_v15  ;;  %v405_v18 = vmax.f32 %v385_v13, 0.0  ;;  %v388_v19 = vadd.f32 %v623_v17, %v526_v31  ;;  %v379_v20 = vpop.f32.mrb[31].mxu1 }
 0x1d9   :  { %630 = vmatprep.subr.bf16.mxu0 %v687_v28  ;;  %v403_v21 = vmax.f32 %v377_v16, 0.0  ;;  %v380_v22 = vadd.f32 %v526_v31, %v379_v20 }
 0x1da   :  { %v406_v23 = vmax.f32 %v388_v19, 0.0 }
 0x1db   :  { %v404_v24 = vmax.f32 %v380_v22, 0.0 }
 0x1dc   :  { %v415_v25 = vpack.c.bf16 %v406_v23, %v405_v18 }
 0x1dd   :  { %v414_v26 = vpack.c.bf16 %v404_v24, %v403_v21 }
 0x1de   :  { %v452_v32 = vsel %vm426_vm2, %v415_v25, 0 }
 0x1df   :  { %v449_v31 = vsel %vm426_vm2, %v414_v26, 0 }
 0x1e0   :  { %631 = vmatpush3.bf16.xpose.msra.mxu0 %v440_v27 }
 0x1e1   :  { %632 = vmatprep.subr.bf16.mxu0 %v687_v28 }
 0x1e8   :  { %633 = vmatpush3.bf16.xpose.msra.mxu0 %v443_v29 }
 0x1e9   :  { %634 = vmatprep.subr.bf16.mxu0 %v687_v28 }
 0x1f0   :  { %635 = vmatpush3.bf16.xpose.msra.mxu0 %v446_v30 }
 0x1f1   :  { %636 = vmatprep.subr.bf16.mxu0 %v687_v28 }
 0x1f8   :  { %637 = vmatpush3.bf16.xpose.msra.mxu0 %v449_v31 }
 0x1f9   :  { %638 = vmatprep.subr.bf16.mxu0 %v687_v28 }
 0x200   :  { %639 = vmatpush3.bf16.xpose.msra.mxu0 %v452_v32 }
 0x207   :  { %641 = vmatmul.mubr.msk.bf16.vlgmr.msra.gmra.mrb[0].mxu0 %vm426_vm2, %v407_v33 }
 0x2da   :  { %v488_v39 = vpop.f32.mrb[0].mxu0 }
 0x2db   :  { %v489_v40 = vadd.f32 %v488_v39, %v425_v38  ;;  %v642_v41 = vpop.f32.mrb[1].mxu0 }
 0x2dc   :  { %v491_v42 = vpop.f32.mrb[2].mxu0 }
 0x2dd   :  { %v536_v43 = vmul.f32 -1.442695, %v489_v40  ;;  %v643_v28 = vpop.f32.mrb[3].mxu0 }
 0x2df   :  { %659 = vpow2.f32 %v536_v43 }
 0x2e9   :  { %v660_v44 = vpop.eup %659 }
 0x2ea   :  { %v497_v45 = vadd.f32 1.0, %v660_v44 }
 0x2ec   :  { %661 = vrcp.f32 %v497_v45 }
 0x2f6   :  { %v662_v46 = vpop.eup %661 }
 0x2f7   :  { %500 = vst [vmem:[#allocation3] sm:$0x1] %v662_v46 }
 0x2f8   :  { %674 = shalt.err (!%p671_p4)
}
 0x2f9   :  { %s675_s11 = scalar_lea.hbm %s866_s7, 16 }
 0x2fa   :  { %p676_p5 = scmp.ne.s32.totalorder %s866_s7, %s675_s11  ;;  %p679_p6 = scmp.lt.u32.totalorder %s675_s11, %s866_s7 }
 0x2fc   :  { %p681_p7 = pnand %p679_p6, %p676_p5 }
 0x2fe   :  { %684 = shalt.err (!%p681_p7)
}
 0x2ff   :  { %510 = dma.vmem_to_hbm [thread:$0]  %s508_s8, 16, %s866_s7, [#allocation4]  }
 0x300   :  { %685 = dma.done.wait [#allocation4], 16  }
 0x301   :  { %686 = vsyncadd [#allocation4], 4294967280 }
 0x302   :  { %514 = vsyncpa [#allocation4], 1 }

</bundles_post_ra>
